<compile_context>
chip_gen: v6e
topology: v6e:2x2x1
jax: 0.10.0
libtpu: 0.0.40
codegen_flags: <defaults>
</compile_context>

<pallas_src>
import functools

import jax
import jax.numpy as jnp
from jax.experimental import pallas as pl
from jax.experimental.pallas import tpu as pltpu


def _pick_tile_hw(hw, n_imgs, cap=65536, min_total_blocks=4):
    """Largest multiple-of-128 divisor of hw that (a) stays under `cap` lanes
    (per-tile working set ~14 B/lane double-buffered -> <1 MiB at the cap) and
    (b) leaves at least `min_total_blocks` grid blocks in the whole call so a
    v7x megacore has work for both TensorCores.  Falls back to the full extent
    when hw is not 128-divisible (a block equal to the full dim is legal)."""
    if hw % 128 != 0:
        return hw
    divisors = [d for d in range(128, hw + 1, 128) if hw % d == 0]
    good = [d for d in divisors
            if d <= cap and n_imgs * (hw // d) >= min_total_blocks]
    if not good:
        good = [d for d in divisors if d <= cap] or divisors
    return max(good)


# ----------------------------------------------------------------------------
# Pass 1 kernel: fused (/255-folded) obj+class head -> confidence map
# ----------------------------------------------------------------------------
def _conf_kernel(x_ref, w_ref, b_ref, o_ref):
    # x_ref: (C, T)    uint8 — image tile, H*W on the lane axis
    # w_ref: (1+NC, C) f32   — obj+class rows of the head, already * 1/255
    # b_ref: (1+NC, 1) f32   — matching bias rows
    # o_ref: (1, T)    f32   — conf = sigmoid(obj) * max_c sigmoid(cls_c)
    c_in = x_ref.shape[0]

    # Staged u8 -> i32 -> f32 widen (known-good Mosaic lowering; one extra
    # VALU op per vreg, irrelevant in this HBM-bound kernel).
    x = x_ref[...].astype(jnp.int32).astype(jnp.float32)            # (C, T)

    # 1x1-conv head for the obj+class channels only, as C broadcast
    # multiply-adds on the VPU (K=C=3, 1+NC rows: too shallow for the MXU;
    # switch to jnp.dot only if the head grows to real-YOLO NO=85).
    y = b_ref[...] + w_ref[:, 0:1] * x[0:1, :]                      # (1+NC, T)
    for c in range(1, c_in):
        y = y + w_ref[:, c:c + 1] * x[c:c + 1, :]

    # Class max in the LOGIT domain (sigmoid is monotonic): only two
    # sigmoids per pixel survive instead of NO.
    obj_logit = y[0:1, :]
    cls_logit_max = jnp.max(y[1:, :], axis=0, keepdims=True)        # (1, T)
    conf = (1.0 / (1.0 + jnp.exp(-obj_logit))) * \
           (1.0 / (1.0 + jnp.exp(-cls_logit_max)))

    # Single coalesced, lane-dense full-tile store.
    o_ref[...] = conf


def run_conf_head(x_chw_u8, w_objcls_t, b_objcls):
    """x_chw_u8: (N, C, HW) uint8 channel-major images.
    w_objcls_t: (1+NC, C) f32 (/255 folded in).  b_objcls: (1+NC, 1) f32.
    Returns the confidence map (N, HW) f32."""
    n, c, hw = x_chw_u8.shape
    no_oc = w_objcls_t.shape[0]
    tile = _pick_tile_hw(hw, n)

    out = pl.pallas_call(
        _conf_kernel,
        out_shape=jax.ShapeDtypeStruct((n, 1, hw), jnp.float32),
        grid=(n, hw // tile),
        in_specs=[
            pl.BlockSpec((pl.Squeezed(), c, tile), lambda i, j: (i, 0, j)),
            pl.BlockSpec((no_oc, c), lambda i, j: (0, 0)),
            pl.BlockSpec((no_oc, 1), lambda i, j: (0, 0)),
        ],
        out_specs=pl.BlockSpec((pl.Squeezed(), 1, tile),
                               lambda i, j: (i, 0, j)),
        # Both grid axes are independent -> both "parallel" (lets a v7x
        # megacore split image x HW-tile blocks across its two TensorCores).
        compiler_params=pltpu.CompilerParams(
            dimension_semantics=("parallel", "parallel")),
        # Advisory for XLA's scheduler: ~3 B/px in + 4 B/px out, 2 exp/px.
        cost_estimate=pl.CostEstimate(
            flops=int(n * hw * (2 * c * no_oc + no_oc)),
            transcendentals=int(2 * n * hw),
            bytes_accessed=int(n * hw * (c + 4))),
    )(x_chw_u8, w_objcls_t, b_objcls)
    return out[:, 0, :]


# ----------------------------------------------------------------------------
# autoShape.forward equivalent (list-of-images path)
# ----------------------------------------------------------------------------
def auto_shape_forward(imgs_hwc_u8, weights, bias, keep=8):
    """imgs_hwc_u8: (N, H, W, C) uint8 stacked HWC images.
    weights: (C, NO) f32 synthetic 1x1-conv detection head, NO = 5 + NC."""
    n, h, w, c = imgs_hwc_u8.shape
    hw = h * w

    # letterbox / make_divisible are identity here (inputs already square and
    # stride-divisible); scale_coords is likewise identity (no resize).
    # Single uint8 HWC->CHW transpose (as the module does); H*W then rides the
    # lane axis in the kernel.  TODO(synk): have the image producer emit
    # channel-major uint8 upstream to drop this extra ~6 B/px HBM pass.
    x_chw = jnp.transpose(imgs_hwc_u8, (0, 3, 1, 2)).reshape(n, c, hw)

    # Fold the /255 preprocessing into the (tiny) head weights once.
    w_f = weights.astype(jnp.float32) * (1.0 / 255.0)                # (C, NO)
    b_f = bias.astype(jnp.float32)                                   # (NO,)

    # ---- Pass 1 (Pallas): objectness*class confidence map only ----
    conf_map = run_conf_head(x_chw, w_f[:, 4:].T,
                             b_f[4:].reshape(-1, 1))                 # (N, HW)

    # TODO(synk): IoU-based non_max_suppression has data-dependent output
    # shapes; confidence-ranked top-k is the fixed-shape stand-in.
    _, idx = jax.lax.top_k(conf_map, keep)                           # (N, keep)

    # ---- Pass 2 (plain JAX, N*keep pixels): decode the kept detections ----
    px = jnp.take_along_axis(x_chw, idx[:, None, :], axis=2)        # (N, C, keep)
    px = jnp.transpose(px, (0, 2, 1)).astype(jnp.float32)           # (N, keep, C)
    s = 1.0 / (1.0 + jnp.exp(-(px @ w_f + b_f)))                    # (N, keep, NO)
    # TODO(synk): real YOLOv5 Detect decode uses per-anchor grid offsets and
    # anchor sizes; the synthetic head treats the sigmoid box outputs as
    # normalized center/size coordinates instead.
    xc, yc = s[..., 0] * w, s[..., 1] * h
    bw, bh = s[..., 2] * w, s[..., 3] * h
    conf_k = s[..., 4] * jnp.max(s[..., 5:], axis=-1)
    cls_k = jnp.argmax(s[..., 5:], axis=-1).astype(jnp.float32)

    xyxy = jnp.stack([xc - 0.5 * bw, yc - 0.5 * bh,
                      xc + 0.5 * bw, yc + 0.5 * bh, conf_k, cls_k], axis=-1)
    xywh = jnp.stack([xc, yc, bw, bh, conf_k, cls_k], axis=-1)

    # Detections normalization: gn = [W, H, W, H, 1, 1]; trailing 1.0s keep
    # conf/cls untouched.  O(N*keep*6) floats -> plain JAX with 1/gn.
    inv_gn = 1.0 / jnp.array([w, h, w, h, 1.0, 1.0], jnp.float32)
    return {"xyxy": xyxy, "xywh": xywh,
            "xyxyn": xyxy * inv_gn, "xywhn": xywh * inv_gn}


if __name__ == "__main__":
    key = jax.random.PRNGKey(0)
    k_img, k_w, k_b = jax.random.split(key, 3)

    N, H, W, C = 2, 16, 16, 3       # two 16x16 RGB images
    NUM_CLASSES = 3
    NO = 5 + NUM_CLASSES            # detection head output channels
    KEEP = 8                        # detections kept per image ("NMS" output)

    imgs = jax.random.randint(k_img, (N, H, W, C), 0, 256,
                              dtype=jnp.int32).astype(jnp.uint8)
    weights = jax.random.normal(k_w, (C, NO), jnp.float32) * 0.1
    bias = jax.random.normal(k_b, (NO,), jnp.float32) * 0.1

    out = jax.block_until_ready(
        auto_shape_forward(imgs, weights, bias, keep=KEEP))

    # Correctness check 1: fused Pallas conf map vs a pure-JAX reference.
    w_f = weights.astype(jnp.float32) * (1.0 / 255.0)
    b_f = bias.astype(jnp.float32)
    x_chw = jnp.transpose(imgs, (0, 3, 1, 2)).reshape(N, C, H * W)
    conf_pl = jax.block_until_ready(
        run_conf_head(x_chw, w_f[:, 4:].T, b_f[4:].reshape(-1, 1)))

    xf = imgs.astype(jnp.float32) / 255.0
    y = jnp.einsum("nhwc,co->nhwo", xf, weights) + bias
    s = 1.0 / (1.0 + jnp.exp(-y))
    ref_conf = (s[..., 4] * jnp.max(s[..., 5:], axis=-1)).reshape(N, H * W)
    assert jnp.allclose(conf_pl, ref_conf, atol=1e-4, rtol=1e-4), \
        "conf map mismatch vs reference"

    # Correctness check 2: decoded kept rows match a reference decode taken
    # at the same (kernel-ranked) indices.
    _, idx = jax.lax.top_k(conf_pl, KEEP)
    rxc, ryc = s[..., 0] * W, s[..., 1] * H
    rbw, rbh = s[..., 2] * W, s[..., 3] * H
    rcls = jnp.argmax(s[..., 5:], axis=-1).astype(jnp.float32)
    ref_rows = jnp.stack(
        [rxc - 0.5 * rbw, ryc - 0.5 * rbh, rxc + 0.5 * rbw, ryc + 0.5 * rbh,
         s[..., 4] * jnp.max(s[..., 5:], axis=-1), rcls],
        axis=-1).reshape(N, H * W, 6)
    ref_kept = jnp.take_along_axis(ref_rows, idx[:, :, None], axis=1)
    assert jnp.allclose(out["xyxy"], ref_kept, atol=1e-3, rtol=1e-3), \
        "kept detections mismatch vs reference"

    for k in ("xyxy", "xywh", "xyxyn", "xywhn"):
        assert out[k].shape == (N, KEEP, 6)
    print("KERNEL_OK")
</pallas_src>

<mosaic_0001>
module attributes {stable_mosaic.version = 11 : i64} {
  func.func @_conf_kernel(%arg0: i32, %arg1: i32, %arg2: memref<1x3x128xi8, #tpu.memory_space<vmem>>, %arg3: memref<4x3xf32, #tpu.memory_space<vmem>>, %arg4: memref<4x1xf32, #tpu.memory_space<vmem>>, %arg5: memref<1x1x128xf32, #tpu.memory_space<vmem>>) attributes {dimension_semantics = [#tpu.dimension_semantics<parallel>, #tpu.dimension_semantics<parallel>], iteration_bounds = array<i64: 2, 2>, scalar_prefetch = 0 : i64, scratch_operands = 0 : i64, tpu.core_type = #tpu.core_type<tc>, window_params = [{transform_indices = @transform_0, window_bounds = array<i64: 1, 3, 128>}, {pipeline_mode = #tpu.pipeline_mode<synchronous>, transform_indices = @transform_1, window_bounds = array<i64: 4, 3>}, {pipeline_mode = #tpu.pipeline_mode<synchronous>, transform_indices = @transform_2, window_bounds = array<i64: 4, 1>}, {transform_indices = @transform_3, window_bounds = array<i64: 1, 1, 128>}]} {
    %c0 = arith.constant 0 : index
    %c0_0 = arith.constant 0 : index
    %c0_1 = arith.constant 0 : index
    %0 = vector.load %arg2[%c0, %c0_0, %c0_1] : memref<1x3x128xi8, #tpu.memory_space<vmem>>, vector<1x3x128xi8>
    %1 = vector.shape_cast %0 : vector<1x3x128xi8> to vector<3x128xi8>
    %2 = arith.extui %1 : vector<3x128xi8> to vector<3x128xi32>
    %3 = arith.sitofp %2 : vector<3x128xi32> to vector<3x128xf32>
    %c0_2 = arith.constant 0 : index
    %c0_3 = arith.constant 0 : index
    %4 = vector.load %arg4[%c0_2, %c0_3] : memref<4x1xf32, #tpu.memory_space<vmem>>, vector<4x1xf32>
    %c0_4 = arith.constant 0 : index
    %c0_5 = arith.constant 0 : index
    %5 = vector.load %arg3[%c0_4, %c0_5] : memref<4x3xf32, #tpu.memory_space<vmem>>, vector<4x1xf32>
    %6 = vector.extract_strided_slice %3 {offsets = [0, 0], sizes = [1, 128], strides = [1, 1]} : vector<3x128xf32> to vector<1x128xf32>
    %7 = vector.broadcast %5 : vector<4x1xf32> to vector<4x128xf32>
    %8 = vector.broadcast %6 : vector<1x128xf32> to vector<4x128xf32>
    %9 = arith.mulf %7, %8 : vector<4x128xf32>
    %10 = vector.broadcast %4 : vector<4x1xf32> to vector<4x128xf32>
    %11 = arith.addf %10, %9 : vector<4x128xf32>
    %c0_6 = arith.constant 0 : index
    %c1 = arith.constant 1 : index
    %12 = vector.load %arg3[%c0_6, %c1] : memref<4x3xf32, #tpu.memory_space<vmem>>, vector<4x1xf32>
    %13 = vector.extract_strided_slice %3 {offsets = [1, 0], sizes = [1, 128], strides = [1, 1]} : vector<3x128xf32> to vector<1x128xf32>
    %14 = vector.broadcast %12 : vector<4x1xf32> to vector<4x128xf32>
    %15 = vector.broadcast %13 : vector<1x128xf32> to vector<4x128xf32>
    %16 = arith.mulf %14, %15 : vector<4x128xf32>
    %17 = arith.addf %11, %16 : vector<4x128xf32>
    %c0_7 = arith.constant 0 : index
    %c2 = arith.constant 2 : index
    %18 = vector.load %arg3[%c0_7, %c2] : memref<4x3xf32, #tpu.memory_space<vmem>>, vector<4x1xf32>
    %19 = vector.extract_strided_slice %3 {offsets = [2, 0], sizes = [1, 128], strides = [1, 1]} : vector<3x128xf32> to vector<1x128xf32>
    %20 = vector.broadcast %18 : vector<4x1xf32> to vector<4x128xf32>
    %21 = vector.broadcast %19 : vector<1x128xf32> to vector<4x128xf32>
    %22 = arith.mulf %20, %21 : vector<4x128xf32>
    %23 = arith.addf %17, %22 : vector<4x128xf32>
    %24 = vector.extract_strided_slice %23 {offsets = [0, 0], sizes = [1, 128], strides = [1, 1]} : vector<4x128xf32> to vector<1x128xf32>
    %25 = vector.extract_strided_slice %23 {offsets = [1, 0], sizes = [3, 128], strides = [1, 1]} : vector<4x128xf32> to vector<3x128xf32>
    %cst = arith.constant dense<0xFF800000> : vector<128xf32>
    %26 = vector.multi_reduction <maximumf>, %25, %cst [0] : vector<3x128xf32> to vector<128xf32>
    %27 = vector.shape_cast %26 : vector<128xf32> to vector<1x128xf32>
    %cst_8 = arith.constant 0.000000e+00 : f32
    %28 = vector.broadcast %cst_8 : f32 to vector<1x128xf32>
    %29 = arith.subf %28, %24 : vector<1x128xf32>
    %30 = math.exp %29 : vector<1x128xf32>
    %cst_9 = arith.constant 1.000000e+00 : f32
    %31 = vector.broadcast %cst_9 : f32 to vector<1x128xf32>
    %32 = arith.addf %31, %30 : vector<1x128xf32>
    %cst_10 = arith.constant 1.000000e+00 : f32
    %33 = vector.broadcast %cst_10 : f32 to vector<1x128xf32>
    %34 = arith.divf %33, %32 : vector<1x128xf32>
    %cst_11 = arith.constant 0.000000e+00 : f32
    %35 = vector.broadcast %cst_11 : f32 to vector<1x128xf32>
    %36 = arith.subf %35, %27 : vector<1x128xf32>
    %37 = math.exp %36 : vector<1x128xf32>
    %cst_12 = arith.constant 1.000000e+00 : f32
    %38 = vector.broadcast %cst_12 : f32 to vector<1x128xf32>
    %39 = arith.addf %38, %37 : vector<1x128xf32>
    %cst_13 = arith.constant 1.000000e+00 : f32
    %40 = vector.broadcast %cst_13 : f32 to vector<1x128xf32>
    %41 = arith.divf %40, %39 : vector<1x128xf32>
    %42 = arith.mulf %34, %41 : vector<1x128xf32>
    %c0_14 = arith.constant 0 : index
    %c0_15 = arith.constant 0 : index
    %c0_16 = arith.constant 0 : index
    %43 = vector.load %arg5[%c0_14, %c0_15, %c0_16] : memref<1x1x128xf32, #tpu.memory_space<vmem>>, vector<1x1x128xf32>
    %44 = vector.shape_cast %43 : vector<1x1x128xf32> to vector<1x128xf32>
    %45 = vector.shape_cast %42 : vector<1x128xf32> to vector<1x1x128xf32>
    tpu.vector_store %arg5[%c0_14, %c0_15, %c0_16], %45 {strides = array<i32>} : memref<1x1x128xf32, #tpu.memory_space<vmem>>, vector<1x1x128xf32>,
    return
  }
  func.func @transform_0(%arg0: i32, %arg1: i32) -> (i32, i32, i32) {
    %c0_i32 = arith.constant 0 : i32
    %c0_i32_0 = arith.constant 0 : i32
    return %arg0, %c0_i32, %arg1 : i32, i32, i32
  }
  func.func @transform_1(%arg0: i32, %arg1: i32) -> (i32, i32) {
    %c0_i32 = arith.constant 0 : i32
    %c0_i32_0 = arith.constant 0 : i32
    %c0_i32_1 = arith.constant 0 : i32
    return %c0_i32, %c0_i32_0 : i32, i32
  }
  func.func @transform_2(%arg0: i32, %arg1: i32) -> (i32, i32) {
    %c0_i32 = arith.constant 0 : i32
    %c0_i32_0 = arith.constant 0 : i32
    %c0_i32_1 = arith.constant 0 : i32
    return %c0_i32, %c0_i32_0 : i32, i32
  }
  func.func @transform_3(%arg0: i32, %arg1: i32) -> (i32, i32, i32) {
    %c0_i32 = arith.constant 0 : i32
    %c0_i32_0 = arith.constant 0 : i32
    return %arg0, %c0_i32, %arg1 : i32, i32, i32
  }
}

</mosaic_0001>

<bundles_post_ra>
// kernel: tpu_custom_call.1
= control target key start
LH: loop header
LB: loop body
LE: loop exit
PB: predicated region body
PF: predicated region fallthrough
CT: control target
= control target key end

     0   :  { %8 = vsyncpa [#allocation3], 0  ;;  %s771_s0 = inlined_call_operand.vmem [shape: u8[2,3,256], index: 0, kind: input, shape index: {}]   ;;  %s772_s1 = inlined_call_operand.hbm [shape: f32[4,3], index: 1, kind: input, shape index: {}]   ;;  %s773_s2 = inlined_call_operand.vmem [shape: f32[4,1], index: 2, kind: input, shape index: {}]   ;;  %s774_s3 = inlined_call_operand.hbm [shape: f32[2,1,256], index: 3, kind: output, shape index: {}]  }
   0x1   :  { %9 = vsyncpa [#allocation4], 0 }
   0x2   :  { %11 = vsyncpa [#allocation4 + $0x1], 0  ;;  %s623_s12 = smov 0   ;;  %s625_s13 = smov 0  }
   0x3   :  { %s627_s14 = smov 0   ;;  %s629_s15 = smov 0  }
   0x4   :  { %s631_s16 = smov 0   ;;  %s633_s17 = smov 0  }
   0x5   :  { %s635_s18 = smov 0   ;;  %s637_s19 = smov 0  }
   0x6 LB: > { %s365_s20 = sadd.s32 4294967295, %s596_s19   ;;  %s366_s21 = sadd.s32 4294967294, %s596_s19   ;;  %s596_s19 = sphi %s637_s19, %s17_s19   ;;  %s592_s18 = sphi %s635_s18, %s786_s18   ;;  %s588_s17 = sphi %s633_s17, %s785_s17   ;;  %s584_s16 = sphi %s631_s16, %s784_s16   ;;  %s580_s15 = sphi %s629_s15, %s783_s15   ;;  %s576_s14 = sphi %s627_s14, %s782_s14   ;;  %s572_s13 = sphi %s625_s13, %s781_s13   ;;  %s568_s12 = sphi %s623_s12, %s780_s12  }
   0x7   : > { %s26_s22 = sadd.s32 1, %s588_s17  ;;  %s29_s23 = sadd.s32 1, %s592_s18 }
   0x8   : > { %p27_p0 = scmp.ge.s32.totalorder %s26_s22, 2  ;;  %s108_s24 = sadd.s32 1, %s576_s14 }
   0x9   : > { %p118_p1 = scmp.ne.s32.totalorder %s576_s14, %s572_s13  ;;  %p119_p2 = scmp.eq.s32.totalorder %s365_s20, 3 }
   0xa   : > { %s788_s22 = smov (%p27_p0, %s26_s22), 0  ;;  %s790_s23 = smov (!%p27_p0, %s29_s23), %s592_s18 }
   0xb   : > { %s104_s25 = ssub.s32 %s588_s17, %s788_s22  ;;  %p675_p3 = por %p119_p2, %p118_p1 }
   0xc   : > { %p31_p4 = scmp.ge.s32.totalorder %s790_s23, 2  ;;  %p124_p5 = scmp.ne.s32.totalorder %s572_s13, %s568_s12 }
   0xd   : > { %p125_p6 = scmp.eq.s32.totalorder %s366_s21, 3  ;;  %p367_p7 = scmp.ge.s32.totalorder %s596_s19, 1 }
   0xe   : > { %s792_s23 = smov (%p31_p4, %s790_s23), 0  ;;  %p132_p9 = scmp.lt.s32.totalorder %s596_s19, 5 }
   0xf   : > { %p684_p8 = por %p125_p6, %p124_p5  ;;  %s103_s28 = ssub.s32 %s592_s18, %s792_s23 }
  0x10   : > { %s105_s29 = sor.u32 %s104_s25, %s103_s28  ;;  %p691_p10 = pnand %p367_p7, %p132_p9 }
  0x11   : > { %s776_s27 = scalar_select %p684_p8, 1, 0 }
  0x12   : > { %p106_p11 = scmp.eq.s32.totalorder %s105_s29, 0  ;;  %p695_p12 = scmp.eq.s32.totalorder %s365_s20, 0 }
  0x13   : > { %p383_p13 = pneg %p691_p10  ;;  %s598_s6 = smov [#allocation2]  }
  0x14   : > { %s702_s5 = scalar_select %p106_p11, %s576_s14, %s108_s24  }
  0x15   : > { %s145_s7 = sshll.u32 %s598_s6, 4  ;;  %p384_p0 = pnand %p695_p12, %p383_p13  ;;  %s146_s7 = int_to_ptr.vmem [resolvable:$true] %s145_s7 }
  0x16   : > { %s485_s8 = scalar_lea.vmem %s146_s7, 64  ;;  %p493_p6 = scmp.lt.s32.totalorder %s146_s7, %s146_s7 }
  0x17   : > { %p476_p1 = pneg %p384_p0  ;;  %p486_p2 = scmp.ne.s32.totalorder %s146_s7, %s485_s8 }
  0x18   : > { %p494_p7 = scmp.lt.s32.totalorder %s485_s8, %s485_s8 }
  0x19   : > { %p488_p4 = pnand %p486_p2, %p476_p1 }
  0x1a   : > { %p495_p9 = por %p494_p7, %p493_p6 }
  0x1b   : > { %p489_p5 = pneg %p488_p4 }
  0x1d   : > { %p496_p8 = pnand %p495_p9, %p489_p5 }
  0x1f   : > { %499 = shalt.err (!%p496_p8)
}
  0x20   : > { %386 = dma.hbm_to_vmem [thread:$0]  (!%p384_p0), %s772_s1, 64, %s146_s7, [#allocation3]  }
  0x21   : > { %171 = sbr.rel (%p691_p10) target bundleno = 237 (0xed), region = 32 }
  0x26   : > { %559 = dma.done.wait (%p695_p12), [#allocation3], 64  }
  0x27   : > { %561 = vsyncadd (%p695_p12), [#allocation3], 4294967232  ;;  %v599_v0 = vmov 0   ;;  %v600_v1 = vmov 1   ;;  %v208_v2 = vld [vmem:[#allocation2] sm:$0xf]  ;;  %v214_v6 = vlaneseq }
  0x28   : > { %462 = vset.pattern.permute.xlu0 %v599_v0  ;;  %463 = vset.pattern.permute.xlu1 %v600_v1  ;;  %v207_v3 = vld [vmem:[%s773_s2] sm:$0xf]  ;;  %v601_v4 = vmov 2   ;;  %p196_p8 = scmp.lt.s32.totalorder %s584_s16, 1  ;;  %p198_p10 = scmp.lt.s32.totalorder %s580_s15, 1  ;;  %vm245_vm0 = vcmask 1043457  }
  0x29   : > { %211 = vperm.xlu0 %462, %v208_v2   ;;  %226 = vperm.xlu1 %463, %v208_v2   ;;  %v215_v8 = vshrl.u32 %v214_v6, 7  ;;  %s194_s6 = sand.u32 1, %s572_s13   ;;  %s373_s7 = sshll.u32 %s584_s16, 1 }
  0x2a   : > { %s197_s21 = scalar_select %p196_p8, %s584_s16, 1 }
  0x2b   : > { %s199_s24 = scalar_select %p198_p10, %s580_s15, 1  ;;  %v216_v10 = vsub.s32 0, %v215_v8  ;;  %v231_v12 = vsub.s32 1, %v215_v8  ;;  %v241_v13 = vsub.s32 2, %v215_v8 }
  0x2c   : > { %s372_s25 = sshll.u32 %s197_s21, 1  ;;  %s278_s8 = sadd.s32 %s580_s15, %s373_s7 }
  0x2d   : > { %221 = vperm.xlu0 %462, %v207_v3   ;;  %464 = vset.pattern.permute.xlu1 %v601_v4  ;;  %s201_s28 = sadd.s32 %s372_s25, %s199_s24  ;;  %s374_s9 = sshll.u32 %s278_s8, 4 }
  0x2e   : > { %236 = vperm.xlu1 %464, %v208_v2   ;;  %s202_s4 = scalar_lea.vmem %s771_s0, %s201_s28  ;;  %s195_s10 = scalar_lea.vmem [#allocation5], %s194_s6 }
  0x2f   : > { %v203_v5 = vld [vmem:[%s202_s4] sm:$0x1]  ;;  %s282_s11 = sshll.u32 %s195_s10, 4  ;;  %s280_s24 = scalar_lea.hbm %s774_s3, %s374_s9  ;;  %s283_s11 = int_to_ptr.vmem [resolvable:$true] %s282_s11 }
  0x30   : > { %v204_v7 = vunpack.c.0.s8 %v203_v5  ;;  %s268_s25 = scalar_lea.sflag [#allocation4], %s194_s6  ;;  %s500_s28 = scalar_lea.vmem %s283_s11, 16 }
  0x31   : > { %465 = vset.pattern.permute.xlu0 %v601_v4  ;;  %p501_p11 = scmp.ne.s32.totalorder %s283_s11, %s500_s28  ;;  %s602_s16 = smov [#allocation5]  }
  0x32   : > { %v205_v9 = vand.u32 255, %v204_v7  ;;  %s504_s15 = sshll.u32 %s602_s16, 4  ;;  %s505_s15 = int_to_ptr.vmem [resolvable:$false] %s504_s15 }
  0x33   : > { %p502_p12 = pnand %p501_p11, %p675_p3  ;;  %s506_s29 = scalar_lea.vmem %s505_s15, 32 }
  0x34   : > { %v206_v11 = vcvt.s32.f32 %v205_v9  ;;  %p507_p0 = scmp.lt.s32.totalorder %s283_s11, %s505_s15  ;;  %p508_p1 = scmp.lt.s32.totalorder %s506_s29, %s500_s28 }
  0x35   : > { %p503_p13 = pneg %p502_p12 }
  0x36   : > { %v217_v14 = vrot.slane %v206_v11, %v216_v10  ;;  %v232_v17 = vrot.slane %v206_v11, %v231_v12  ;;  %v242_v18 = vrot.slane %v206_v11, %v241_v13  ;;  %p509_p2 = por %p508_p1, %p507_p0 }
  0x38   : > { %p510_p4 = pnand %p509_p2, %p503_p13 }
  0xa4   : > { %v212_v15 = vpop.permute.xlu0 %211  ;;  %v227_v16 = vpop.permute.xlu1 %226 }
  0xa5   : > { %v218_v19 = vmul.f32 %v217_v14, %v212_v15  ;;  %v233_v21 = vmul.f32 %v232_v17, %v227_v16 }
  0xa8   : > { %v222_v20 = vpop.permute.xlu0 %221 }
  0xa9   : > { %v224_v22 = vadd.f32 %v222_v20, %v218_v19  ;;  %v237_v23 = vpop.permute.xlu1 %236 }
  0xaa   : > { %v243_v24 = vmul.f32 %v242_v18, %v237_v23 }
  0xab   : > { %v234_v25 = vadd.f32 %v233_v21, %v224_v22 }
  0xad   : > { %v244_v26 = vadd.f32 %v243_v24, %v234_v25 }
  0xaf   : > { %v246_v27 = vsel %vm245_vm0, %v244_v26, -inf  ;;  %v253_v30 = vsub.f32 0.0, %v244_v26 }
  0xb0   : > { %v247_v28 = vrot.slane %v246_v27, 4 }
  0xb1   : > { %v254_v33 = vmul.f32 1.442695, %v253_v30 }
  0xb2   : > { %v248_v29 = vmax.f32 %v246_v27, %v247_v28 }
  0xb3   : > { %466 = vpow2.f32 %v254_v33 }
  0xb4   : > { %v249_v31 = vrot.slane %v248_v29, 2 }
  0xb6   : > { %v250_v32 = vmax.f32 %v248_v29, %v249_v31 }
  0xb8   : > { %v251_v34 = vrot.slane %v250_v32, 1 }
  0xba   : > { %v252_v35 = vmax.f32 %v250_v32, %v251_v34 }
  0xbc   : > { %v259_v36 = vsub.f32 0.0, %v252_v35 }
  0xbe   : > { %v260_v37 = vmul.f32 1.442695, %v259_v36 }
  0xc0   : > { %468 = vpow2.f32 %v260_v37  ;;  %v467_v38 = vpop.eup %466 }
  0xc1   : > { %v256_v39 = vadd.f32 1.0, %v467_v38 }
  0xc3   : > { %470 = vrcp.f32 %v256_v39 }
  0xcd   : > { %v469_v40 = vpop.eup %468 }
  0xce   : > { %v262_v41 = vadd.f32 1.0, %v469_v40 }
  0xd0   : > { %472 = vrcp.f32 %v262_v41  ;;  %v471_v42 = vpop.eup %470 }
  0xdd   : > { %v473_v43 = vpop.eup %472 }
  0xde   : > { %v265_v44 = vmul.f32 %v473_v43, %v471_v42 }
  0xe0   : > { %266 = vst [vmem:[%s195_s10] sm:$0x1] %v265_v44 }
  0xe1   : > { %513 = shalt.err (!%p510_p4)
}
  0xe2   : > { %s514_s30 = scalar_lea.hbm %s280_s24, 16  ;;  %s518_s7 = scalar_lea.hbm %s774_s3, 64 }
  0xe3   : > { %p515_p5 = scmp.ne.s32.totalorder %s280_s24, %s514_s30  ;;  %p519_p9 = scmp.lt.s32.totalorder %s280_s24, %s774_s3 }
  0xe4   : > { %p520_p8 = scmp.lt.s32.totalorder %s518_s7, %s514_s30 }
  0xe5   : > { %p516_p6 = pnand %p515_p5, %p675_p3 }
  0xe6   : > { %p521_p10 = por %p520_p8, %p519_p9 }
  0xe7   : > { %p517_p7 = pneg %p516_p6 }
  0xe9   : > { %p522_p11 = pnand %p521_p10, %p517_p7 }
  0xeb   : > { %525 = shalt.err (!%p522_p11)
}
  0xec   : > { %381 = dma.vmem_to_hbm [thread:$0]  (%p675_p3), %s283_s11, 16, %s280_s24, %s268_s25  }
  0xed PF: > { %p393_p12 = scmp.ge.s32.totalorder %s596_s19, 2  ;;  %s294_s10 = sand.u32 1, %s568_s12  }
  0xee   : > { %p779_p13 = scmp.ne.s32.totalorder %s776_s27, 0  ;;  %s295_s20 = scalar_lea.sflag [#allocation4], %s294_s10 }
  0xf0   : > { %p388_p0 = pnand %p393_p12, %p779_p13 }
  0xf2   : > { %p389_p1 = pneg %p388_p0 }
  0xf4   : > { %563 = dma.done.wait (%p389_p1), %s295_s20, 16  }
  0xf5   : > { %565 = vsyncadd (%p389_p1), %s295_s20, 4294967280  ;;  %s17_s19 = sadd.s32 1, %s596_s19   ;;  %s780_s12 = smov %s572_s13 }
  0xf6   : > { %p14_p2 = scmp.ge.s32.totalorder %s17_s19, 6   ;;  %s781_s13 = smov %s576_s14 }
  0xf7   : > { %s782_s14 = smov %s702_s5  ;;  %s783_s15 = smov %s588_s17 }
  0xf8   : > { %s784_s16 = smov %s592_s18  ;;  %s785_s17 = smov %s788_s22 }
  0xf9   : > { %s786_s18 = smov %s792_s23  ;;  %16 = sbr.rel (!%p14_p2) target bundleno = 6 (0x6), region = 72 }
  0xfe   :  { %299 = vsyncpa [#allocation3], 1 }
  0xff   :  { %301 = vsyncpa [#allocation3 + $0x1], 1 }
 0x100   :  { %302 = vsyncpa [#allocation4], 1 }
 0x101   :  { %304 = vsyncpa [#allocation4 + $0x1], 1 }

</bundles_post_ra>
